<compile_context>
chip_gen: v6e
topology: v6e:2x2x1
jax: 0.10.0
libtpu: 0.0.40
codegen_flags: <defaults>
</compile_context>

<pallas_src>
import functools

import jax
import jax.numpy as jnp
from jax.experimental import pallas as pl
from jax.experimental.pallas import tpu as pltpu

T_BLK = 8  # decode steps per grid invocation (one full (8, 128) output tile)


def _window_decode_kernel(idx0_ref, x_ref, w_ref, buf_in_ref, buf_out_ref, out_ref,
                          *, t_valid, n_tblocks):
    """One lane tile, T_BLK consecutive decode steps.

    idx0_ref:    SMEM scalar-prefetch (1,) int32 — write index for global step 0.
    x_ref:       (T_BLK, tile_n) samples for this time block.
    w_ref:       (W, 1) normalized window weights (resident, constant block).
    buf_in_ref:  (W, tile_n) previous rolling-buffer tile (DMA'd once per lane tile).
    buf_out_ref: (W, tile_n) rolling-buffer tile, VMEM-resident across time blocks.
    out_ref:     (T_BLK, tile_n) decoded outputs for this time block.
    """
    tb = pl.program_id(1)
    w_len = buf_out_ref.shape[0]

    # Bring the buffer tile into the resident output block once per lane tile.
    @pl.when(tb == 0)
    def _():
        buf_out_ref[...] = buf_in_ref[...]

    w = w_ref[...]            # (W, 1), hoisted out of the step loop
    idx0 = idx0_ref[0]

    def do_step(s):
        # buffer[(index0 + t) % W] = x_t   — dynamic single-row store.
        idx = (idx0 + tb * T_BLK + s) % w_len
        buf_out_ref[pl.ds(idx, 1), :] = x_ref[pl.ds(s, 1), :]
        # Exact weighted window reduce (VPU mul + sublane reduce).
        # TODO(synk): optional incremental accumulator (acc += k[idx]*(x - old_row))
        # would cut per-step reduce work ~W x at the cost of small f32 drift.
        out_ref[pl.ds(s, 1), :] = jnp.sum(buf_out_ref[...] * w, axis=0,
                                          keepdims=True)

    # Tail masking: only steps s >= (t_valid % T_BLK) of the LAST time block are
    # padding; every other step is emitted unconditionally (no scf.if overhead).
    rem = t_valid % T_BLK
    for s in range(T_BLK):
        if rem == 0 or s < rem:
            do_step(s)
        else:
            @pl.when(tb < n_tblocks - 1)
            def _(s=s):
                do_step(s)


def _pick_tile_n(n_pad: int) -> int:
    """Lane-tile width (n_pad is a multiple of 128).

    Cap at 4096 (keeps the live (W, tile_n) working set well within vregs/VMEM);
    when a single tile would cover everything, split into two >=512-lane tiles
    so the 'parallel' lane axis can shard across both v7x TensorCores.
    """
    if n_pad > 4096:
        for cand in (4096, 2048, 1024, 512, 256, 128):
            if n_pad % cand == 0:
                return cand
    if n_pad >= 1024 and n_pad % 256 == 0:
        return n_pad // 2
    return n_pad


@functools.partial(jax.jit, donate_argnums=(0,))
def window_decode_steps(buf, xs, weights, index0):
    """Run T decode steps in a single fused pallas_call.

    buf:     (W, N_pad) float32 rolling buffer (donated, updated in place);
             N_pad is a multiple of 128 (guaranteed by the wrapper class).
    xs:      (T, N) float32 samples (N <= N_pad), applied in order.
    weights: (W, 1) float32 normalized window kernel.
    index0:  (1,) int32 write index for xs[0].
    Returns (new_buffer (W, N_pad), decoded (T, N)).
    """
    W, N_pad = buf.shape
    T, N = xs.shape

    # Pad time to a multiple of T_BLK and lanes to N_pad so every x/out DMA is a
    # full, lane-dense (8, tile_n) block (no masked partial stores).
    n_tblocks = pl.cdiv(T, T_BLK)
    T_pad = n_tblocks * T_BLK
    xs_p = jnp.zeros((T_pad, N_pad), jnp.float32).at[:T, :N].set(
        xs.astype(jnp.float32))

    tile_n = _pick_tile_n(N_pad)
    n_tiles = N_pad // tile_n

    kernel = functools.partial(_window_decode_kernel,
                               t_valid=T, n_tblocks=n_tblocks)

    cost = pl.CostEstimate(
        flops=2 * W * T_pad * N_pad,
        transcendentals=0,
        bytes_accessed=(2 * W * N_pad + 2 * T_pad * N_pad) * 4,
    )

    new_buf, out = pl.pallas_call(
        kernel,
        out_shape=(
            jax.ShapeDtypeStruct((W, N_pad), jnp.float32),      # updated buffer
            jax.ShapeDtypeStruct((T_pad, N_pad), jnp.float32),  # decoded outputs
        ),
        grid_spec=pltpu.PrefetchScalarGridSpec(
            num_scalar_prefetch=1,
            grid=(n_tiles, n_tblocks),
            in_specs=[
                # xs: one lane-dense (T_BLK, tile_n) block per (tile, time-block)
                pl.BlockSpec((T_BLK, tile_n), lambda j, tb, idx0: (tb, j)),
                # weights: resident, constant block
                pl.BlockSpec((W, 1), lambda j, tb, idx0: (0, 0)),
                # buffer (previous state): fetched once per lane tile
                pl.BlockSpec((W, tile_n), lambda j, tb, idx0: (0, j)),
            ],
            out_specs=(
                # buffer out: same block for all time blocks -> VMEM-resident,
                # written back to HBM once per lane tile
                pl.BlockSpec((W, tile_n), lambda j, tb, idx0: (0, j)),
                # decoded output: lane-dense (T_BLK, tile_n) block
                pl.BlockSpec((T_BLK, tile_n), lambda j, tb, idx0: (tb, j)),
            ),
        ),
        # Alias the buffer input (flat operand index 3: idx0, xs, weights, buf)
        # to output 0 so the update happens in place in HBM.
        input_output_aliases={3: 0},
        compiler_params=pltpu.CompilerParams(
            dimension_semantics=("parallel", "arbitrary"),
        ),
        cost_estimate=cost,
    )(index0, xs_p, weights, buf)

    return new_buf, out[:T, :N]


class ExponentialWindowDecoder:
    """Concrete realization of BaseWindowDecoder.

    The abstract `kernel()` is realized as a deterministic exponential window
    k[i] = exp(-i / tau), normalized to sum to 1 and shaped (W, 1), matching
    `self._kernel /= self._kernel.sum(); .view(W, 1)` in __init__.  Mutable
    state (rolling buffer, write index) is held Python-side like the nn.Module
    attributes; the hot path (buffer row write + weighted window reduction)
    runs fused in Pallas and accepts either a single sample (N,) or a batch of
    T samples (T, N) applied in order.
    """

    def __init__(self, window_length: int, tau: float = 2.0):
        k = jnp.exp(-jnp.arange(window_length, dtype=jnp.float32) / tau)
        k = k / jnp.sum(k)
        self._weights = k.reshape(window_length, 1)
        self._window_length = window_length
        self._index = 0
        self._n = None
        self._buffer_p = None  # (W, N_pad) lane-padded rolling buffer

    @property
    def buffer(self):
        """Rolling-buffer contents at the logical (unpadded) width."""
        if self._buffer_p is None:
            return None
        return self._buffer_p[:, : self._n]

    def __call__(self, x):
        x = jnp.asarray(x, dtype=jnp.float32)
        single = x.ndim == 1
        xs = x[None, :] if single else x
        n = xs.shape[-1]
        if self._buffer_p is None:
            self._n = n
            n_pad = ((n + 127) // 128) * 128
            self._buffer_p = jnp.zeros((self._window_length, n_pad),
                                       dtype=jnp.float32)
        idx0 = jnp.asarray([self._index], dtype=jnp.int32)
        new_buf, out = window_decode_steps(self._buffer_p, xs, self._weights, idx0)
        self._buffer_p = new_buf
        self._index = (self._index + xs.shape[0]) % self._window_length
        return out[0] if single else out


def _reference_step(buf, x, weights, index):
    """Pure-JAX reference of the PyTorch forward (one sample)."""
    new_buf = buf.at[index].set(x)
    return new_buf, jnp.sum(new_buf * weights, axis=0)


if __name__ == "__main__":
    W = 8     # window_length
    N = 200   # deliberately NOT a multiple of 128: exercises lane padding
    T = 12    # fused batch (exercises T padding to 16 and modular wrap-around)

    key = jax.random.PRNGKey(0)
    decoder = ExponentialWindowDecoder(W)
    weights = decoder._weights

    ref_buf = jnp.zeros((W, N), dtype=jnp.float32)
    ref_idx = 0

    # Phase 1: single-sample forward calls (original per-step semantics).
    for step in range(5):
        key, sub = jax.random.split(key)
        x = jax.random.normal(sub, (N,), dtype=jnp.float32)
        out = decoder(x)
        ref_buf, ref_out = _reference_step(ref_buf, x, weights, ref_idx)
        ref_idx = (ref_idx + 1) % W
        assert out.shape == (N,)
        assert jnp.allclose(out, ref_out, atol=1e-5, rtol=1e-5), (
            f"single-step mismatch at step {step}"
        )

    # Phase 2: one fused call over T steps in a single pallas_call.
    key, sub = jax.random.split(key)
    xs = jax.random.normal(sub, (T, N), dtype=jnp.float32)
    outs = decoder(xs)
    jax.block_until_ready(outs)
    assert outs.shape == (T, N)
    for t in range(T):
        ref_buf, ref_out = _reference_step(ref_buf, xs[t], weights, ref_idx)
        ref_idx = (ref_idx + 1) % W
        assert jnp.allclose(outs[t], ref_out, atol=1e-5, rtol=1e-5), (
            f"fused mismatch at step {t}"
        )

    # Final state matches the reference (buffer contents and write index).
    assert jnp.allclose(decoder.buffer, ref_buf, atol=1e-6)
    assert decoder._index == ref_idx

    jax.block_until_ready(decoder._buffer_p)
    print("KERNEL_OK")
</pallas_src>

<mosaic_0001>
module attributes {stable_mosaic.version = 11 : i64} {
  func.func @_window_decode_kernel(%arg0: i32, %arg1: i32, %arg2: memref<1xi32, #tpu.memory_space<smem>>, %arg3: memref<8x256xf32, #tpu.memory_space<vmem>>, %arg4: memref<8x1xf32, #tpu.memory_space<vmem>>, %arg5: memref<8x256xf32, #tpu.memory_space<vmem>>, %arg6: memref<8x256xf32, #tpu.memory_space<vmem>>, %arg7: memref<8x256xf32, #tpu.memory_space<vmem>>) attributes {dimension_semantics = [#tpu.dimension_semantics<parallel>, #tpu.dimension_semantics<arbitrary>], iteration_bounds = array<i64: 1, 1>, scalar_prefetch = 1 : i64, scratch_operands = 0 : i64, tpu.core_type = #tpu.core_type<tc>, window_params = [{transform_indices = @transform_0, window_bounds = array<i64: 8, 256>}, {pipeline_mode = #tpu.pipeline_mode<synchronous>, transform_indices = @transform_1, window_bounds = array<i64: 8, 1>}, {transform_indices = @transform_2, window_bounds = array<i64: 8, 256>}, {transform_indices = @transform_3, window_bounds = array<i64: 8, 256>}, {transform_indices = @transform_4, window_bounds = array<i64: 8, 256>}]} {
    %c0_i32 = arith.constant 0 : i32
    %0 = arith.cmpi eq, %arg1, %c0_i32 : i32
    %1 = arith.extui %0 : i1 to i32
    %c0_i32_0 = arith.constant 0 : i32
    %2 = arith.cmpi ne, %1, %c0_i32_0 : i32
    scf.if %2 {
      %c0_30 = arith.constant 0 : index
      %c0_31 = arith.constant 0 : index
      %48 = vector.load %arg5[%c0_30, %c0_31] : memref<8x256xf32, #tpu.memory_space<vmem>>, vector<8x256xf32>
      %c0_32 = arith.constant 0 : index
      %c0_33 = arith.constant 0 : index
      %49 = vector.load %arg6[%c0_32, %c0_33] : memref<8x256xf32, #tpu.memory_space<vmem>>, vector<8x256xf32>
      tpu.vector_store %arg6[%c0_32, %c0_33], %48 {strides = array<i32>} : memref<8x256xf32, #tpu.memory_space<vmem>>, vector<8x256xf32>,
    } else {
    }
    %c0 = arith.constant 0 : index
    %c0_1 = arith.constant 0 : index
    %3 = vector.load %arg4[%c0, %c0_1] : memref<8x1xf32, #tpu.memory_space<vmem>>, vector<8x1xf32>
    %c0_2 = arith.constant 0 : index
    %4 = memref.load %arg2[%c0_2] : memref<1xi32, #tpu.memory_space<smem>>
    %c8_i32 = arith.constant 8 : i32
    %5 = arith.muli %arg1, %c8_i32 : i32
    %6 = arith.addi %4, %5 : i32
    %c0_i32_3 = arith.constant 0 : i32
    %7 = arith.addi %6, %c0_i32_3 : i32
    %c8_i32_4 = arith.constant 8 : i32
    %c0_i32_5 = arith.constant 0 : i32
    %8 = arith.cmpi eq, %c8_i32_4, %c0_i32_5 : i32
    %c1_i32 = arith.constant 1 : i32
    %9 = arith.select %8, %c1_i32, %c8_i32_4 : i32
    %10 = arith.remsi %7, %9 : i32
    %c0_i32_6 = arith.constant 0 : i32
    %11 = arith.cmpi ne, %10, %c0_i32_6 : i32
    %c0_i32_7 = arith.constant 0 : i32
    %12 = arith.cmpi slt, %10, %c0_i32_7 : i32
    %c0_i32_8 = arith.constant 0 : i32
    %13 = arith.cmpi slt, %9, %c0_i32_8 : i32
    %14 = arith.xori %12, %13 : i1
    %15 = arith.andi %14, %11 : i1
    %16 = arith.addi %10, %9 : i32
    %17 = arith.select %15, %16, %10 : i32
    %c0_9 = arith.constant 0 : index
    %c0_10 = arith.constant 0 : index
    %18 = vector.load %arg3[%c0_9, %c0_10] : memref<8x256xf32, #tpu.memory_space<vmem>>, vector<1x256xf32>
    %19 = arith.index_cast %17 : i32 to index
    %c0_11 = arith.constant 0 : index
    %20 = vector.load %arg6[%19, %c0_11] : memref<8x256xf32, #tpu.memory_space<vmem>>, vector<1x256xf32>
    tpu.vector_store %arg6[%19, %c0_11], %18 {strides = array<i32>} : memref<8x256xf32, #tpu.memory_space<vmem>>, vector<1x256xf32>,
    %c0_12 = arith.constant 0 : index
    %c0_13 = arith.constant 0 : index
    %21 = vector.load %arg6[%c0_12, %c0_13] : memref<8x256xf32, #tpu.memory_space<vmem>>, vector<8x256xf32>
    %22 = vector.broadcast %3 : vector<8x1xf32> to vector<8x256xf32>
    %23 = arith.mulf %21, %22 : vector<8x256xf32>
    %cst = arith.constant dense<0.000000e+00> : vector<256xf32>
    %24 = vector.multi_reduction <add>, %23, %cst [0] : vector<8x256xf32> to vector<256xf32>
    %25 = vector.shape_cast %24 : vector<256xf32> to vector<1x256xf32>
    %c0_14 = arith.constant 0 : index
    %c0_15 = arith.constant 0 : index
    %26 = vector.load %arg7[%c0_14, %c0_15] : memref<8x256xf32, #tpu.memory_space<vmem>>, vector<1x256xf32>
    tpu.vector_store %arg7[%c0_14, %c0_15], %25 {strides = array<i32>} : memref<8x256xf32, #tpu.memory_space<vmem>>, vector<1x256xf32>,
    %c0_i32_16 = arith.constant 0 : i32
    %27 = arith.cmpi slt, %arg1, %c0_i32_16 : i32
    %28 = arith.extui %27 : i1 to i32
    %c0_i32_17 = arith.constant 0 : i32
    %29 = arith.cmpi ne, %28, %c0_i32_17 : i32
    scf.if %29 {
      %c8_i32_30 = arith.constant 8 : i32
      %48 = arith.muli %arg1, %c8_i32_30 : i32
      %49 = arith.addi %4, %48 : i32
      %c1_i32_31 = arith.constant 1 : i32
      %50 = arith.addi %49, %c1_i32_31 : i32
      %c8_i32_32 = arith.constant 8 : i32
      %c0_i32_33 = arith.constant 0 : i32
      %51 = arith.cmpi eq, %c8_i32_32, %c0_i32_33 : i32
      %c1_i32_34 = arith.constant 1 : i32
      %52 = arith.select %51, %c1_i32_34, %c8_i32_32 : i32
      %53 = arith.remsi %50, %52 : i32
      %c0_i32_35 = arith.constant 0 : i32
      %54 = arith.cmpi ne, %53, %c0_i32_35 : i32
      %c0_i32_36 = arith.constant 0 : i32
      %55 = arith.cmpi slt, %53, %c0_i32_36 : i32
      %c0_i32_37 = arith.constant 0 : i32
      %56 = arith.cmpi slt, %52, %c0_i32_37 : i32
      %57 = arith.xori %55, %56 : i1
      %58 = arith.andi %57, %54 : i1
      %59 = arith.addi %53, %52 : i32
      %60 = arith.select %58, %59, %53 : i32
      %c1 = arith.constant 1 : index
      %c0_38 = arith.constant 0 : index
      %61 = vector.load %arg3[%c1, %c0_38] : memref<8x256xf32, #tpu.memory_space<vmem>>, vector<1x256xf32>
      %62 = arith.index_cast %60 : i32 to index
      %c0_39 = arith.constant 0 : index
      %63 = vector.load %arg6[%62, %c0_39] : memref<8x256xf32, #tpu.memory_space<vmem>>, vector<1x256xf32>
      tpu.vector_store %arg6[%62, %c0_39], %61 {strides = array<i32>} : memref<8x256xf32, #tpu.memory_space<vmem>>, vector<1x256xf32>,
      %c0_40 = arith.constant 0 : index
      %c0_41 = arith.constant 0 : index
      %64 = vector.load %arg6[%c0_40, %c0_41] : memref<8x256xf32, #tpu.memory_space<vmem>>, vector<8x256xf32>
      %65 = vector.broadcast %3 : vector<8x1xf32> to vector<8x256xf32>
      %66 = arith.mulf %64, %65 : vector<8x256xf32>
      %cst_42 = arith.constant dense<0.000000e+00> : vector<256xf32>
      %67 = vector.multi_reduction <add>, %66, %cst_42 [0] : vector<8x256xf32> to vector<256xf32>
      %68 = vector.shape_cast %67 : vector<256xf32> to vector<1x256xf32>
      %c1_43 = arith.constant 1 : index
      %c0_44 = arith.constant 0 : index
      %69 = vector.load %arg7[%c1_43, %c0_44] : memref<8x256xf32, #tpu.memory_space<vmem>>, vector<1x256xf32>
      tpu.vector_store %arg7[%c1_43, %c0_44], %68 {strides = array<i32>} : memref<8x256xf32, #tpu.memory_space<vmem>>, vector<1x256xf32>,
    } else {
    }
    %c0_i32_18 = arith.constant 0 : i32
    %30 = arith.cmpi slt, %arg1, %c0_i32_18 : i32
    %31 = arith.extui %30 : i1 to i32
    %c0_i32_19 = arith.constant 0 : i32
    %32 = arith.cmpi ne, %31, %c0_i32_19 : i32
    scf.if %32 {
      %c8_i32_30 = arith.constant 8 : i32
      %48 = arith.muli %arg1, %c8_i32_30 : i32
      %49 = arith.addi %4, %48 : i32
      %c2_i32 = arith.constant 2 : i32
      %50 = arith.addi %49, %c2_i32 : i32
      %c8_i32_31 = arith.constant 8 : i32
      %c0_i32_32 = arith.constant 0 : i32
      %51 = arith.cmpi eq, %c8_i32_31, %c0_i32_32 : i32
      %c1_i32_33 = arith.constant 1 : i32
      %52 = arith.select %51, %c1_i32_33, %c8_i32_31 : i32
      %53 = arith.remsi %50, %52 : i32
      %c0_i32_34 = arith.constant 0 : i32
      %54 = arith.cmpi ne, %53, %c0_i32_34 : i32
      %c0_i32_35 = arith.constant 0 : i32
      %55 = arith.cmpi slt, %53, %c0_i32_35 : i32
      %c0_i32_36 = arith.constant 0 : i32
      %56 = arith.cmpi slt, %52, %c0_i32_36 : i32
      %57 = arith.xori %55, %56 : i1
      %58 = arith.andi %57, %54 : i1
      %59 = arith.addi %53, %52 : i32
      %60 = arith.select %58, %59, %53 : i32
      %c2 = arith.constant 2 : index
      %c0_37 = arith.constant 0 : index
      %61 = vector.load %arg3[%c2, %c0_37] : memref<8x256xf32, #tpu.memory_space<vmem>>, vector<1x256xf32>
      %62 = arith.index_cast %60 : i32 to index
      %c0_38 = arith.constant 0 : index
      %63 = vector.load %arg6[%62, %c0_38] : memref<8x256xf32, #tpu.memory_space<vmem>>, vector<1x256xf32>
      tpu.vector_store %arg6[%62, %c0_38], %61 {strides = array<i32>} : memref<8x256xf32, #tpu.memory_space<vmem>>, vector<1x256xf32>,
      %c0_39 = arith.constant 0 : index
      %c0_40 = arith.constant 0 : index
      %64 = vector.load %arg6[%c0_39, %c0_40] : memref<8x256xf32, #tpu.memory_space<vmem>>, vector<8x256xf32>
      %65 = vector.broadcast %3 : vector<8x1xf32> to vector<8x256xf32>
      %66 = arith.mulf %64, %65 : vector<8x256xf32>
      %cst_41 = arith.constant dense<0.000000e+00> : vector<256xf32>
      %67 = vector.multi_reduction <add>, %66, %cst_41 [0] : vector<8x256xf32> to vector<256xf32>
      %68 = vector.shape_cast %67 : vector<256xf32> to vector<1x256xf32>
      %c2_42 = arith.constant 2 : index
      %c0_43 = arith.constant 0 : index
      %69 = vector.load %arg7[%c2_42, %c0_43] : memref<8x256xf32, #tpu.memory_space<vmem>>, vector<1x256xf32>
      tpu.vector_store %arg7[%c2_42, %c0_43], %68 {strides = array<i32>} : memref<8x256xf32, #tpu.memory_space<vmem>>, vector<1x256xf32>,
    } else {
    }
    %c0_i32_20 = arith.constant 0 : i32
    %33 = arith.cmpi slt, %arg1, %c0_i32_20 : i32
    %34 = arith.extui %33 : i1 to i32
    %c0_i32_21 = arith.constant 0 : i32
    %35 = arith.cmpi ne, %34, %c0_i32_21 : i32
    scf.if %35 {
      %c8_i32_30 = arith.constant 8 : i32
      %48 = arith.muli %arg1, %c8_i32_30 : i32
      %49 = arith.addi %4, %48 : i32
      %c3_i32 = arith.constant 3 : i32
      %50 = arith.addi %49, %c3_i32 : i32
      %c8_i32_31 = arith.constant 8 : i32
      %c0_i32_32 = arith.constant 0 : i32
      %51 = arith.cmpi eq, %c8_i32_31, %c0_i32_32 : i32
      %c1_i32_33 = arith.constant 1 : i32
      %52 = arith.select %51, %c1_i32_33, %c8_i32_31 : i32
      %53 = arith.remsi %50, %52 : i32
      %c0_i32_34 = arith.constant 0 : i32
      %54 = arith.cmpi ne, %53, %c0_i32_34 : i32
      %c0_i32_35 = arith.constant 0 : i32
      %55 = arith.cmpi slt, %53, %c0_i32_35 : i32
      %c0_i32_36 = arith.constant 0 : i32
      %56 = arith.cmpi slt, %52, %c0_i32_36 : i32
      %57 = arith.xori %55, %56 : i1
      %58 = arith.andi %57, %54 : i1
      %59 = arith.addi %53, %52 : i32
      %60 = arith.select %58, %59, %53 : i32
      %c3 = arith.constant 3 : index
      %c0_37 = arith.constant 0 : index
      %61 = vector.load %arg3[%c3, %c0_37] : memref<8x256xf32, #tpu.memory_space<vmem>>, vector<1x256xf32>
      %62 = arith.index_cast %60 : i32 to index
      %c0_38 = arith.constant 0 : index
      %63 = vector.load %arg6[%62, %c0_38] : memref<8x256xf32, #tpu.memory_space<vmem>>, vector<1x256xf32>
      tpu.vector_store %arg6[%62, %c0_38], %61 {strides = array<i32>} : memref<8x256xf32, #tpu.memory_space<vmem>>, vector<1x256xf32>,
      %c0_39 = arith.constant 0 : index
      %c0_40 = arith.constant 0 : index
      %64 = vector.load %arg6[%c0_39, %c0_40] : memref<8x256xf32, #tpu.memory_space<vmem>>, vector<8x256xf32>
      %65 = vector.broadcast %3 : vector<8x1xf32> to vector<8x256xf32>
      %66 = arith.mulf %64, %65 : vector<8x256xf32>
      %cst_41 = arith.constant dense<0.000000e+00> : vector<256xf32>
      %67 = vector.multi_reduction <add>, %66, %cst_41 [0] : vector<8x256xf32> to vector<256xf32>
      %68 = vector.shape_cast %67 : vector<256xf32> to vector<1x256xf32>
      %c3_42 = arith.constant 3 : index
      %c0_43 = arith.constant 0 : index
      %69 = vector.load %arg7[%c3_42, %c0_43] : memref<8x256xf32, #tpu.memory_space<vmem>>, vector<1x256xf32>
      tpu.vector_store %arg7[%c3_42, %c0_43], %68 {strides = array<i32>} : memref<8x256xf32, #tpu.memory_space<vmem>>, vector<1x256xf32>,
    } else {
    }
    %c0_i32_22 = arith.constant 0 : i32
    %36 = arith.cmpi slt, %arg1, %c0_i32_22 : i32
    %37 = arith.extui %36 : i1 to i32
    %c0_i32_23 = arith.constant 0 : i32
    %38 = arith.cmpi ne, %37, %c0_i32_23 : i32
    scf.if %38 {
      %c8_i32_30 = arith.constant 8 : i32
      %48 = arith.muli %arg1, %c8_i32_30 : i32
      %49 = arith.addi %4, %48 : i32
      %c4_i32 = arith.constant 4 : i32
      %50 = arith.addi %49, %c4_i32 : i32
      %c8_i32_31 = arith.constant 8 : i32
      %c0_i32_32 = arith.constant 0 : i32
      %51 = arith.cmpi eq, %c8_i32_31, %c0_i32_32 : i32
      %c1_i32_33 = arith.constant 1 : i32
      %52 = arith.select %51, %c1_i32_33, %c8_i32_31 : i32
      %53 = arith.remsi %50, %52 : i32
      %c0_i32_34 = arith.constant 0 : i32
      %54 = arith.cmpi ne, %53, %c0_i32_34 : i32
      %c0_i32_35 = arith.constant 0 : i32
      %55 = arith.cmpi slt, %53, %c0_i32_35 : i32
      %c0_i32_36 = arith.constant 0 : i32
      %56 = arith.cmpi slt, %52, %c0_i32_36 : i32
      %57 = arith.xori %55, %56 : i1
      %58 = arith.andi %57, %54 : i1
      %59 = arith.addi %53, %52 : i32
      %60 = arith.select %58, %59, %53 : i32
      %c4 = arith.constant 4 : index
      %c0_37 = arith.constant 0 : index
      %61 = vector.load %arg3[%c4, %c0_37] : memref<8x256xf32, #tpu.memory_space<vmem>>, vector<1x256xf32>
      %62 = arith.index_cast %60 : i32 to index
      %c0_38 = arith.constant 0 : index
      %63 = vector.load %arg6[%62, %c0_38] : memref<8x256xf32, #tpu.memory_space<vmem>>, vector<1x256xf32>
      tpu.vector_store %arg6[%62, %c0_38], %61 {strides = array<i32>} : memref<8x256xf32, #tpu.memory_space<vmem>>, vector<1x256xf32>,
      %c0_39 = arith.constant 0 : index
      %c0_40 = arith.constant 0 : index
      %64 = vector.load %arg6[%c0_39, %c0_40] : memref<8x256xf32, #tpu.memory_space<vmem>>, vector<8x256xf32>
      %65 = vector.broadcast %3 : vector<8x1xf32> to vector<8x256xf32>
      %66 = arith.mulf %64, %65 : vector<8x256xf32>
      %cst_41 = arith.constant dense<0.000000e+00> : vector<256xf32>
      %67 = vector.multi_reduction <add>, %66, %cst_41 [0] : vector<8x256xf32> to vector<256xf32>
      %68 = vector.shape_cast %67 : vector<256xf32> to vector<1x256xf32>
      %c4_42 = arith.constant 4 : index
      %c0_43 = arith.constant 0 : index
      %69 = vector.load %arg7[%c4_42, %c0_43] : memref<8x256xf32, #tpu.memory_space<vmem>>, vector<1x256xf32>
      tpu.vector_store %arg7[%c4_42, %c0_43], %68 {strides = array<i32>} : memref<8x256xf32, #tpu.memory_space<vmem>>, vector<1x256xf32>,
    } else {
    }
    %c0_i32_24 = arith.constant 0 : i32
    %39 = arith.cmpi slt, %arg1, %c0_i32_24 : i32
    %40 = arith.extui %39 : i1 to i32
    %c0_i32_25 = arith.constant 0 : i32
    %41 = arith.cmpi ne, %40, %c0_i32_25 : i32
    scf.if %41 {
      %c8_i32_30 = arith.constant 8 : i32
      %48 = arith.muli %arg1, %c8_i32_30 : i32
      %49 = arith.addi %4, %48 : i32
      %c5_i32 = arith.constant 5 : i32
      %50 = arith.addi %49, %c5_i32 : i32
      %c8_i32_31 = arith.constant 8 : i32
      %c0_i32_32 = arith.constant 0 : i32
      %51 = arith.cmpi eq, %c8_i32_31, %c0_i32_32 : i32
      %c1_i32_33 = arith.constant 1 : i32
      %52 = arith.select %51, %c1_i32_33, %c8_i32_31 : i32
      %53 = arith.remsi %50, %52 : i32
      %c0_i32_34 = arith.constant 0 : i32
      %54 = arith.cmpi ne, %53, %c0_i32_34 : i32
      %c0_i32_35 = arith.constant 0 : i32
      %55 = arith.cmpi slt, %53, %c0_i32_35 : i32
      %c0_i32_36 = arith.constant 0 : i32
      %56 = arith.cmpi slt, %52, %c0_i32_36 : i32
      %57 = arith.xori %55, %56 : i1
      %58 = arith.andi %57, %54 : i1
      %59 = arith.addi %53, %52 : i32
      %60 = arith.select %58, %59, %53 : i32
      %c5 = arith.constant 5 : index
      %c0_37 = arith.constant 0 : index
      %61 = vector.load %arg3[%c5, %c0_37] : memref<8x256xf32, #tpu.memory_space<vmem>>, vector<1x256xf32>
      %62 = arith.index_cast %60 : i32 to index
      %c0_38 = arith.constant 0 : index
      %63 = vector.load %arg6[%62, %c0_38] : memref<8x256xf32, #tpu.memory_space<vmem>>, vector<1x256xf32>
      tpu.vector_store %arg6[%62, %c0_38], %61 {strides = array<i32>} : memref<8x256xf32, #tpu.memory_space<vmem>>, vector<1x256xf32>,
      %c0_39 = arith.constant 0 : index
      %c0_40 = arith.constant 0 : index
      %64 = vector.load %arg6[%c0_39, %c0_40] : memref<8x256xf32, #tpu.memory_space<vmem>>, vector<8x256xf32>
      %65 = vector.broadcast %3 : vector<8x1xf32> to vector<8x256xf32>
      %66 = arith.mulf %64, %65 : vector<8x256xf32>
      %cst_41 = arith.constant dense<0.000000e+00> : vector<256xf32>
      %67 = vector.multi_reduction <add>, %66, %cst_41 [0] : vector<8x256xf32> to vector<256xf32>
      %68 = vector.shape_cast %67 : vector<256xf32> to vector<1x256xf32>
      %c5_42 = arith.constant 5 : index
      %c0_43 = arith.constant 0 : index
      %69 = vector.load %arg7[%c5_42, %c0_43] : memref<8x256xf32, #tpu.memory_space<vmem>>, vector<1x256xf32>
      tpu.vector_store %arg7[%c5_42, %c0_43], %68 {strides = array<i32>} : memref<8x256xf32, #tpu.memory_space<vmem>>, vector<1x256xf32>,
    } else {
    }
    %c0_i32_26 = arith.constant 0 : i32
    %42 = arith.cmpi slt, %arg1, %c0_i32_26 : i32
    %43 = arith.extui %42 : i1 to i32
    %c0_i32_27 = arith.constant 0 : i32
    %44 = arith.cmpi ne, %43, %c0_i32_27 : i32
    scf.if %44 {
      %c8_i32_30 = arith.constant 8 : i32
      %48 = arith.muli %arg1, %c8_i32_30 : i32
      %49 = arith.addi %4, %48 : i32
      %c6_i32 = arith.constant 6 : i32
      %50 = arith.addi %49, %c6_i32 : i32
      %c8_i32_31 = arith.constant 8 : i32
      %c0_i32_32 = arith.constant 0 : i32
      %51 = arith.cmpi eq, %c8_i32_31, %c0_i32_32 : i32
      %c1_i32_33 = arith.constant 1 : i32
      %52 = arith.select %51, %c1_i32_33, %c8_i32_31 : i32
      %53 = arith.remsi %50, %52 : i32
      %c0_i32_34 = arith.constant 0 : i32
      %54 = arith.cmpi ne, %53, %c0_i32_34 : i32
      %c0_i32_35 = arith.constant 0 : i32
      %55 = arith.cmpi slt, %53, %c0_i32_35 : i32
      %c0_i32_36 = arith.constant 0 : i32
      %56 = arith.cmpi slt, %52, %c0_i32_36 : i32
      %57 = arith.xori %55, %56 : i1
      %58 = arith.andi %57, %54 : i1
      %59 = arith.addi %53, %52 : i32
      %60 = arith.select %58, %59, %53 : i32
      %c6 = arith.constant 6 : index
      %c0_37 = arith.constant 0 : index
      %61 = vector.load %arg3[%c6, %c0_37] : memref<8x256xf32, #tpu.memory_space<vmem>>, vector<1x256xf32>
      %62 = arith.index_cast %60 : i32 to index
      %c0_38 = arith.constant 0 : index
      %63 = vector.load %arg6[%62, %c0_38] : memref<8x256xf32, #tpu.memory_space<vmem>>, vector<1x256xf32>
      tpu.vector_store %arg6[%62, %c0_38], %61 {strides = array<i32>} : memref<8x256xf32, #tpu.memory_space<vmem>>, vector<1x256xf32>,
      %c0_39 = arith.constant 0 : index
      %c0_40 = arith.constant 0 : index
      %64 = vector.load %arg6[%c0_39, %c0_40] : memref<8x256xf32, #tpu.memory_space<vmem>>, vector<8x256xf32>
      %65 = vector.broadcast %3 : vector<8x1xf32> to vector<8x256xf32>
      %66 = arith.mulf %64, %65 : vector<8x256xf32>
      %cst_41 = arith.constant dense<0.000000e+00> : vector<256xf32>
      %67 = vector.multi_reduction <add>, %66, %cst_41 [0] : vector<8x256xf32> to vector<256xf32>
      %68 = vector.shape_cast %67 : vector<256xf32> to vector<1x256xf32>
      %c6_42 = arith.constant 6 : index
      %c0_43 = arith.constant 0 : index
      %69 = vector.load %arg7[%c6_42, %c0_43] : memref<8x256xf32, #tpu.memory_space<vmem>>, vector<1x256xf32>
      tpu.vector_store %arg7[%c6_42, %c0_43], %68 {strides = array<i32>} : memref<8x256xf32, #tpu.memory_space<vmem>>, vector<1x256xf32>,
    } else {
    }
    %c0_i32_28 = arith.constant 0 : i32
    %45 = arith.cmpi slt, %arg1, %c0_i32_28 : i32
    %46 = arith.extui %45 : i1 to i32
    %c0_i32_29 = arith.constant 0 : i32
    %47 = arith.cmpi ne, %46, %c0_i32_29 : i32
    scf.if %47 {
      %c8_i32_30 = arith.constant 8 : i32
      %48 = arith.muli %arg1, %c8_i32_30 : i32
      %49 = arith.addi %4, %48 : i32
      %c7_i32 = arith.constant 7 : i32
      %50 = arith.addi %49, %c7_i32 : i32
      %c8_i32_31 = arith.constant 8 : i32
      %c0_i32_32 = arith.constant 0 : i32
      %51 = arith.cmpi eq, %c8_i32_31, %c0_i32_32 : i32
      %c1_i32_33 = arith.constant 1 : i32
      %52 = arith.select %51, %c1_i32_33, %c8_i32_31 : i32
      %53 = arith.remsi %50, %52 : i32
      %c0_i32_34 = arith.constant 0 : i32
      %54 = arith.cmpi ne, %53, %c0_i32_34 : i32
      %c0_i32_35 = arith.constant 0 : i32
      %55 = arith.cmpi slt, %53, %c0_i32_35 : i32
      %c0_i32_36 = arith.constant 0 : i32
      %56 = arith.cmpi slt, %52, %c0_i32_36 : i32
      %57 = arith.xori %55, %56 : i1
      %58 = arith.andi %57, %54 : i1
      %59 = arith.addi %53, %52 : i32
      %60 = arith.select %58, %59, %53 : i32
      %c7 = arith.constant 7 : index
      %c0_37 = arith.constant 0 : index
      %61 = vector.load %arg3[%c7, %c0_37] : memref<8x256xf32, #tpu.memory_space<vmem>>, vector<1x256xf32>
      %62 = arith.index_cast %60 : i32 to index
      %c0_38 = arith.constant 0 : index
      %63 = vector.load %arg6[%62, %c0_38] : memref<8x256xf32, #tpu.memory_space<vmem>>, vector<1x256xf32>
      tpu.vector_store %arg6[%62, %c0_38], %61 {strides = array<i32>} : memref<8x256xf32, #tpu.memory_space<vmem>>, vector<1x256xf32>,
      %c0_39 = arith.constant 0 : index
      %c0_40 = arith.constant 0 : index
      %64 = vector.load %arg6[%c0_39, %c0_40] : memref<8x256xf32, #tpu.memory_space<vmem>>, vector<8x256xf32>
      %65 = vector.broadcast %3 : vector<8x1xf32> to vector<8x256xf32>
      %66 = arith.mulf %64, %65 : vector<8x256xf32>
      %cst_41 = arith.constant dense<0.000000e+00> : vector<256xf32>
      %67 = vector.multi_reduction <add>, %66, %cst_41 [0] : vector<8x256xf32> to vector<256xf32>
      %68 = vector.shape_cast %67 : vector<256xf32> to vector<1x256xf32>
      %c7_42 = arith.constant 7 : index
      %c0_43 = arith.constant 0 : index
      %69 = vector.load %arg7[%c7_42, %c0_43] : memref<8x256xf32, #tpu.memory_space<vmem>>, vector<1x256xf32>
      tpu.vector_store %arg7[%c7_42, %c0_43], %68 {strides = array<i32>} : memref<8x256xf32, #tpu.memory_space<vmem>>, vector<1x256xf32>,
    } else {
    }
    return
  }
  func.func @transform_0(%arg0: i32, %arg1: i32, %arg2: memref<1xi32, #tpu.memory_space<smem>>) -> (i32, i32) {
    %c0_i32 = arith.constant 0 : i32
    return %arg1, %arg0 : i32, i32
  }
  func.func @transform_1(%arg0: i32, %arg1: i32, %arg2: memref<1xi32, #tpu.memory_space<smem>>) -> (i32, i32) {
    %c0_i32 = arith.constant 0 : i32
    %c0_i32_0 = arith.constant 0 : i32
    %c0_i32_1 = arith.constant 0 : i32
    return %c0_i32, %c0_i32_0 : i32, i32
  }
  func.func @transform_2(%arg0: i32, %arg1: i32, %arg2: memref<1xi32, #tpu.memory_space<smem>>) -> (i32, i32) {
    %c0_i32 = arith.constant 0 : i32
    %c0_i32_0 = arith.constant 0 : i32
    return %c0_i32, %arg0 : i32, i32
  }
  func.func @transform_3(%arg0: i32, %arg1: i32, %arg2: memref<1xi32, #tpu.memory_space<smem>>) -> (i32, i32) {
    %c0_i32 = arith.constant 0 : i32
    %c0_i32_0 = arith.constant 0 : i32
    return %c0_i32, %arg0 : i32, i32
  }
  func.func @transform_4(%arg0: i32, %arg1: i32, %arg2: memref<1xi32, #tpu.memory_space<smem>>) -> (i32, i32) {
    %c0_i32 = arith.constant 0 : i32
    return %arg1, %arg0 : i32, i32
  }
}

</mosaic_0001>

<bundles_post_ra>
// kernel: window_decode_steps.1
= control target key start
LH: loop header
LB: loop body
LE: loop exit
PB: predicated region body
PF: predicated region fallthrough
CT: control target
= control target key end

     0   :  { %v633_v0 = vmov 0   ;;  %v43_v4 = vlaneseq  ;;  %v634_v14 = vmov 1966171168   ;;  %s712_s2 = inlined_call_operand.vmem [shape: f32[8,1], index: 2, kind: input, shape index: {}]   ;;  %s713_s3 = inlined_call_operand.vmem [shape: f32[8,256], index: 3, kind: input, shape index: {}, may-alias: {3,4}]   ;;  %s714_s4 = inlined_call_operand.vmem [shape: f32[8,256], index: 4, kind: output, shape index: {0}, may-alias: {3,4}]   ;;  %s715_s0 = inlined_call_operand.<no memory space> [shape: s32[1], index: 0, kind: input, shape index: {}]   ;;  %s716_s1 = inlined_call_operand.vmem [shape: f32[8,256], index: 1, kind: input, shape index: {}]   ;;  %s717_s5 = inlined_call_operand.vmem [shape: f32[8,256], index: 5, kind: output, shape index: {1}]  }
   0x1   :  { %632 = vset.pattern.permute.xlu0 %v633_v0  ;;  %v26_v1 = vld [vmem:[%s712_s2] sm:$0xff]  ;;  %v23_v3 = vld [vmem:[%s713_s3 + $0x8] sm:$0xff]  ;;  %p30_p0 = scmp.lt.s32.totalorder %s715_s0, 0  ;;  %s31_s28 = ssub.s32 0, %s715_s0  ;;  %v82_v15 = vunpack.c.l.s4 %v634_v14 }
   0x2   :  { %v22_v2 = vld [vmem:[%s713_s3] sm:$0xff]  ;;  %61 = vperm.xlu0 %632, %v26_v1   ;;  %s568_s3 = smin.u32 %s31_s28, %s715_s0  ;;  %vm689_vm0 = vcmp.lt.s32.totalorder %v43_v4, 256  ;;  %v85_v21 = vshrl.u32 %v43_v4, 7 }
   0x3   :  { %24 = vst [vmem:[%s714_s4] sm:$0xff] %v22_v2  ;;  %25 = vst [vmem:[%s714_s4 + $0x8] sm:$0xff] %v23_v3  ;;  %s33_s9 = sand.u32 7, %s568_s3   ;;  %v42_v6 = vld [vmem:[%s716_s1] ss:$8 sm:$0x3]  ;;  %v83_v20 = vunpack.c.0.s8 %v82_v15 }
   0x4   :  { %s34_s10 = ssub.s32 0, %s33_s9 }
   0x5   :  { %s721_s10 = smov (!%p30_p0, %s34_s10), %s33_s9  ;;  %v86_v26 = vsub.s32 %v83_v20, %v85_v21 }
   0x6   :  { %p570_p1 = scmp.lt.s32.totalorder %s721_s10, 0  ;;  %s40_s11 = sadd.s32 8, %s721_s10 }
   0x8   :  { %s723_s11 = smov (!%p570_p1, %s40_s11), %s721_s10 }
   0x9   :  { %s47_s12 = sshra.s32 %s723_s11, 3  ;;  %s50_s13 = sand.u32 7, %s723_s11 }
   0xa   :  { %s622_s16 = sshll.u32 %s47_s12, 4 }
   0xb   :  { %s53_s17 = sadd.s32 %s622_s16, %s50_s13 }
   0xc   :  { %s54_s19 = scalar_lea.vmem %s714_s4, %s53_s17 }
   0xd   :  { %55 = vst.msk [vmem:[%s54_s19] ss:$8 sm:$0x3] %vm689_vm0, %v42_v6 }
  0x14   :  { %v57_v7 = vld [vmem:[%s714_s4] sm:$0xff]  ;;  %v58_v8 = vld [vmem:[%s714_s4 + $0x8] sm:$0xff] }
  0x7d   :  { %v62_v9 = vpop.permute.xlu0 %61 }
  0x7e   :  { %v64_v10 = vmul.f32 %v62_v9, %v57_v7  ;;  %v65_v11 = vmul.f32 %v62_v9, %v58_v8 }
  0x80   :  { %v66_v12 = vrot.slane %v64_v10, 4  ;;  %v72_v13 = vrot.slane %v65_v11, 4 }
  0x82   :  { %v67_v16 = vadd.f32 %v66_v12, %v64_v10  ;;  %v73_v17 = vadd.f32 %v72_v13, %v65_v11 }
  0x84   :  { %v68_v18 = vrot.slane %v67_v16, 2  ;;  %v74_v19 = vrot.slane %v73_v17, 2 }
  0x86   :  { %v69_v22 = vadd.f32 %v68_v18, %v67_v16  ;;  %v75_v23 = vadd.f32 %v74_v19, %v73_v17 }
  0x88   :  { %v70_v24 = vrot.slane %v69_v22, 1  ;;  %v76_v25 = vrot.slane %v75_v23, 1 }
  0x8a   :  { %v71_v27 = vadd.f32 %v70_v24, %v69_v22  ;;  %v77_v28 = vadd.f32 %v76_v25, %v75_v23 }
  0x8c   :  { %v80_v29 = vcombine.low %v71_v27, %v77_v28 }
  0x8e   :  { %v87_v30 = vrot.slane %v80_v29, %v86_v26 }
  0x90   :  { %v94_v31 = vrot.slane %v87_v30, %v86_v26 }
  0x92   :  { %96 = vst.msk [vmem:[%s717_s5] ss:$8 sm:$0x3] %vm689_vm0, %v94_v31 }

</bundles_post_ra>
